<compile_context>
chip_gen: v7x
topology: tpu7x:2x2x1
jax: 0.10.0
libtpu: 0.0.40
codegen_flags: <defaults>
</compile_context>

<pallas_src>
import jax
import jax.numpy as jnp
from jax.experimental import pallas as pl
from jax.experimental.pallas import tpu as pltpu


def _round_up(x, m):
    return ((x + m - 1) // m) * m


def _mlp_kernel(e0_ref, eg_ref, le_ref,
                w1a_ref, w1b_ref, w1c_ref, b1_ref,
                w2_ref, b2_ref,
                w3_ref, b3_ref,
                w4_ref, b4_ref,
                w5_ref, b5_ref,
                out_ref):
    """Fused 5-layer MLP head on one (TB, ...) batch-row tile."""
    f32 = jnp.float32
    cdt = w1a_ref.dtype   # MXU compute dtype (bf16 by default; f32 supported)

    # Layer 1: cat([e0, eg, le], -1) @ W1 == e0 @ W1a + eg @ W1b + le @ W1c.
    # The concatenated activation never exists in HBM or VMEM.
    # NOTE: if the producer can emit a single (B, 2*im_dim+lang_dim) slab,
    # collapse these three partial matmuls / DMA streams into one (saves MXU
    # pipeline fill + DMA descriptors when the per-chunk K is small).
    h = (jnp.dot(e0_ref[...].astype(cdt), w1a_ref[...], preferred_element_type=f32)
         + jnp.dot(eg_ref[...].astype(cdt), w1b_ref[...], preferred_element_type=f32)
         + jnp.dot(le_ref[...].astype(cdt), w1c_ref[...], preferred_element_type=f32)
         + b1_ref[...])
    h = jnp.maximum(h, 0.0)

    for w_ref, b_ref in ((w2_ref, b2_ref), (w3_ref, b3_ref), (w4_ref, b4_ref)):
        h = jnp.dot(h.astype(cdt), w_ref[...], preferred_element_type=f32) + b_ref[...]
        h = jnp.maximum(h, 0.0)

    # Final projection to 1 feature.  The (TB, 1) store is lane-sparse, but the
    # masked-store epilogue is hidden under the input DMA and output bytes are
    # ~4 B/row, so we keep the natural sublane layout rather than paying an
    # in-kernel sublane->lane relayout for a lane-dense store.
    out = jnp.dot(h.astype(cdt), w5_ref[...], preferred_element_type=f32) + b5_ref[...]
    out_ref[...] = out.astype(out_ref.dtype)


def init_language_reward_params(key, im_dim, hidden_dim, lang_dim,
                                dtype=jnp.float32):
    """PyTorch-style init: U(-1/sqrt(fan_in), 1/sqrt(fan_in)).

    Weights stored as (in_features, out_features) so each layer is y = x @ W + b.
    """
    in_dim = im_dim * 2 + lang_dim
    dims = [(in_dim, hidden_dim),
            (hidden_dim, hidden_dim),
            (hidden_dim, hidden_dim),
            (hidden_dim, hidden_dim),
            (hidden_dim, 1)]
    params = []
    for fan_in, fan_out in dims:
        key, kw, kb = jax.random.split(key, 3)
        bound = 1.0 / jnp.sqrt(jnp.asarray(fan_in, dtype))
        w = jax.random.uniform(kw, (fan_in, fan_out), dtype,
                               minval=-bound, maxval=bound)
        b = jax.random.uniform(kb, (1, fan_out), dtype,
                               minval=-bound, maxval=bound)
        params.append((w, b))
    return params


def prepare_language_reward_params(params, im_dim, compute_dtype=jnp.bfloat16):
    """One-time host prep: row-split W1 and cast weights to the MXU compute
    dtype.  Do this once, not per forward call."""
    (w1, b1), (w2, b2), (w3, b3), (w4, b4), (w5, b5) = params
    cdt = compute_dtype
    f32 = jnp.float32
    return (w1[:im_dim].astype(cdt),
            w1[im_dim:2 * im_dim].astype(cdt),
            w1[2 * im_dim:].astype(cdt),
            b1.astype(f32),
            w2.astype(cdt), b2.astype(f32),
            w3.astype(cdt), b3.astype(f32),
            w4.astype(cdt), b4.astype(f32),
            w5.astype(cdt), b5.astype(f32))


_VMEM_TILE_BUDGET = 40 * 1024 * 1024   # stay well under v7x's 64 MiB physical


def _vmem_bytes(tb, row_bytes, weight_bytes):
    # 2x double-buffered input tiles + 2x resident weights (constant-index
    # blocks are still double-buffered by the pipeline) + 2x output tile.
    # TODO(synk): pipeline_mode=pl.Buffered(1) on the weight specs would halve
    # their footprint; left at the default for robustness.
    return 2 * tb * row_bytes + 2 * weight_bytes + 2 * tb * 4


def _choose_batch_tile(batch, batch_tile, row_bytes, weight_bytes):
    tb = max(8, _round_up(min(batch_tile, _round_up(batch, 8)), 8))
    # v7x has 2 TensorCores/chip: make sure the batch grid has >= 2 steps
    # whenever the batch is big enough to split, so "parallel" can shard it.
    if batch >= 16 and pl.cdiv(batch, tb) < 2:
        tb = _round_up(pl.cdiv(batch, 2), 8)
    # Shrink until double-buffered tiles + resident weights fit the budget
    # (binding on v5e's 16 MiB scoped default and v7x's 64 MiB physical VMEM).
    while tb > 8 and _vmem_bytes(tb, row_bytes, weight_bytes) > _VMEM_TILE_BUDGET:
        tb = max(8, _round_up(tb // 2, 8))
    return tb


def language_reward_forward(e0, eg, le, prepared_params, *, batch_tile=1024):
    """Equivalent of LanguageReward.forward: returns (reward, info).

    Pass e0/eg/le as bf16 if the producer can emit them that way — it halves
    the activation HBM traffic, which dominates at these shapes.
    """
    B, im_dim = e0.shape
    lang_dim = le.shape[-1]
    (w1a, w1b, w1c, b1, w2, b2, w3, b3, w4, b4, w5, b5) = prepared_params
    assert w1a.shape[0] == im_dim and w1c.shape[0] == lang_dim
    hidden_dim = w1a.shape[1]

    weights = (w1a, w1b, w1c, b1, w2, b2, w3, b3, w4, b4, w5, b5)

    row_bytes = (e0.dtype.itemsize * im_dim + eg.dtype.itemsize * im_dim
                 + le.dtype.itemsize * lang_dim)
    weight_bytes = sum(int(a.size) * a.dtype.itemsize for a in weights)

    TB = _choose_batch_tile(B, batch_tile, row_bytes, weight_bytes)
    # No host-side padding: Pallas masks the partial tail block. Tail garbage
    # stays confined to tail rows (no cross-row reduction anywhere).
    grid = (pl.cdiv(B, TB),)

    def row_spec(d):
        return pl.BlockSpec((TB, d), lambda i: (i, 0))

    def const_spec(a):
        # Block index never changes across grid steps -> weight stays
        # VMEM-resident (Pallas skips re-DMA for unchanged blocks).
        return pl.BlockSpec(a.shape, lambda i: (0, 0))

    in_specs = ([row_spec(im_dim), row_spec(im_dim), row_spec(lang_dim)]
                + [const_spec(a) for a in weights])
    out_spec = pl.BlockSpec((TB, 1), lambda i: (i, 0))

    in_dim = 2 * im_dim + lang_dim
    rows = grid[0] * TB
    flops = int(2 * rows * (in_dim * hidden_dim
                            + 3 * hidden_dim * hidden_dim
                            + hidden_dim))
    bytes_accessed = int(B * row_bytes + weight_bytes + B * 4)

    vmem_limit = int(min(64 << 20,
                         max(32 << 20,
                             _vmem_bytes(TB, row_bytes, weight_bytes) + (4 << 20))))

    out = pl.pallas_call(
        _mlp_kernel,
        out_shape=jax.ShapeDtypeStruct((B, 1), jnp.float32),
        grid=grid,
        in_specs=in_specs,
        out_specs=out_spec,
        compiler_params=pltpu.CompilerParams(
            dimension_semantics=("parallel",),
            vmem_limit_bytes=vmem_limit),
        cost_estimate=pl.CostEstimate(
            flops=flops, transcendentals=0, bytes_accessed=bytes_accessed),
    )(e0, eg, le, *weights)

    reward = jnp.squeeze(out)   # matches torch .squeeze()
    info = {}
    # TODO(synk): ltype / simfunc / Sigmoid are unused in the module's forward,
    # so they are intentionally not implemented.
    return reward, info


def _reference_forward(e0, eg, le, params, *, bf16_matmul=True):
    """Pure-JAX reference (optionally replicating bf16-operand matmuls)."""
    x = jnp.concatenate([e0, eg, le], axis=-1)
    n = len(params)
    for i, (w, b) in enumerate(params):
        if bf16_matmul:
            y = jnp.dot(x.astype(jnp.bfloat16), w.astype(jnp.bfloat16),
                        preferred_element_type=jnp.float32) + b.astype(jnp.float32)
        else:
            y = jnp.dot(x.astype(jnp.float32), w, preferred_element_type=jnp.float32) + b
        x = jnp.maximum(y, 0.0) if i < n - 1 else y
    return jnp.squeeze(x)


if __name__ == "__main__":
    # Small shapes consistent with the module.
    im_dim = 32
    hidden_dim = 32
    lang_dim = 32

    key = jax.random.PRNGKey(0)
    k0, k1, k2, kp = jax.random.split(key, 4)

    params = init_language_reward_params(kp, im_dim, hidden_dim, lang_dim)
    prepared = prepare_language_reward_params(params, im_dim)   # bf16 weights, once

    # --- Test 1: small batch, single tile, f32 activations. ----------------
    batch = 8
    e0 = jax.random.normal(k0, (batch, im_dim), jnp.float32)
    eg = jax.random.normal(k1, (batch, im_dim), jnp.float32)
    le = jax.random.normal(k2, (batch, lang_dim), jnp.float32)

    reward, info = language_reward_forward(e0, eg, le, prepared)
    reward = jax.block_until_ready(reward)
    assert reward.shape == (batch,), reward.shape

    ref_bf16 = _reference_forward(e0, eg, le, params, bf16_matmul=True)
    ref_f32 = _reference_forward(e0, eg, le, params, bf16_matmul=False)
    assert jnp.allclose(reward, ref_bf16, atol=3e-3, rtol=3e-3), (reward, ref_bf16)
    assert jnp.allclose(reward, ref_f32, atol=5e-2, rtol=5e-2), (reward, ref_f32)

    # --- Test 2: multi-tile grid with a ragged tail (no host padding) and
    #             bf16 activations (halved input HBM traffic). --------------
    batch2 = 203
    k3, k4, k5 = jax.random.split(jax.random.PRNGKey(1), 3)
    e0b = jax.random.normal(k3, (batch2, im_dim), jnp.float32).astype(jnp.bfloat16)
    egb = jax.random.normal(k4, (batch2, im_dim), jnp.float32).astype(jnp.bfloat16)
    leb = jax.random.normal(k5, (batch2, lang_dim), jnp.float32).astype(jnp.bfloat16)

    reward2, _ = language_reward_forward(e0b, egb, leb, prepared, batch_tile=64)
    reward2 = jax.block_until_ready(reward2)
    assert reward2.shape == (batch2,), reward2.shape

    ref2 = _reference_forward(e0b, egb, leb, params, bf16_matmul=True)
    assert jnp.allclose(reward2, ref2, atol=3e-3, rtol=3e-3), (reward2, ref2)

    print("KERNEL_OK")
</pallas_src>

<mosaic_0001>
module attributes {stable_mosaic.version = 11 : i64} {
  func.func @_mlp_kernel(%arg0: i32, %arg1: memref<8x32xf32, #tpu.memory_space<vmem>>, %arg2: memref<8x32xf32, #tpu.memory_space<vmem>>, %arg3: memref<8x32xf32, #tpu.memory_space<vmem>>, %arg4: memref<32x32xbf16, #tpu.memory_space<vmem>>, %arg5: memref<32x32xbf16, #tpu.memory_space<vmem>>, %arg6: memref<32x32xbf16, #tpu.memory_space<vmem>>, %arg7: memref<1x32xf32, #tpu.memory_space<vmem>>, %arg8: memref<32x32xbf16, #tpu.memory_space<vmem>>, %arg9: memref<1x32xf32, #tpu.memory_space<vmem>>, %arg10: memref<32x32xbf16, #tpu.memory_space<vmem>>, %arg11: memref<1x32xf32, #tpu.memory_space<vmem>>, %arg12: memref<32x32xbf16, #tpu.memory_space<vmem>>, %arg13: memref<1x32xf32, #tpu.memory_space<vmem>>, %arg14: memref<32x1xbf16, #tpu.memory_space<vmem>>, %arg15: memref<1x1xf32, #tpu.memory_space<vmem>>, %arg16: memref<8x1xf32, #tpu.memory_space<vmem>>) attributes {dimension_semantics = [#tpu.dimension_semantics<parallel>], iteration_bounds = array<i64: 1>, scalar_prefetch = 0 : i64, scratch_operands = 0 : i64, tpu.core_type = #tpu.core_type<tc>, window_params = [{transform_indices = @transform_0, window_bounds = array<i64: 8, 32>}, {transform_indices = @transform_1, window_bounds = array<i64: 8, 32>}, {transform_indices = @transform_2, window_bounds = array<i64: 8, 32>}, {pipeline_mode = #tpu.pipeline_mode<synchronous>, transform_indices = @transform_3, window_bounds = array<i64: 32, 32>}, {pipeline_mode = #tpu.pipeline_mode<synchronous>, transform_indices = @transform_4, window_bounds = array<i64: 32, 32>}, {pipeline_mode = #tpu.pipeline_mode<synchronous>, transform_indices = @transform_5, window_bounds = array<i64: 32, 32>}, {pipeline_mode = #tpu.pipeline_mode<synchronous>, transform_indices = @transform_6, window_bounds = array<i64: 1, 32>}, {pipeline_mode = #tpu.pipeline_mode<synchronous>, transform_indices = @transform_7, window_bounds = array<i64: 32, 32>}, {pipeline_mode = #tpu.pipeline_mode<synchronous>, transform_indices = @transform_8, window_bounds = array<i64: 1, 32>}, {pipeline_mode = #tpu.pipeline_mode<synchronous>, transform_indices = @transform_9, window_bounds = array<i64: 32, 32>}, {pipeline_mode = #tpu.pipeline_mode<synchronous>, transform_indices = @transform_10, window_bounds = array<i64: 1, 32>}, {pipeline_mode = #tpu.pipeline_mode<synchronous>, transform_indices = @transform_11, window_bounds = array<i64: 32, 32>}, {pipeline_mode = #tpu.pipeline_mode<synchronous>, transform_indices = @transform_12, window_bounds = array<i64: 1, 32>}, {pipeline_mode = #tpu.pipeline_mode<synchronous>, transform_indices = @transform_13, window_bounds = array<i64: 32, 1>}, {pipeline_mode = #tpu.pipeline_mode<synchronous>, transform_indices = @transform_14, window_bounds = array<i64: 1, 1>}, {transform_indices = @transform_15, window_bounds = array<i64: 8, 1>}]} {
    %c0 = arith.constant 0 : index
    %c0_0 = arith.constant 0 : index
    %0 = vector.load %arg1[%c0, %c0_0] : memref<8x32xf32, #tpu.memory_space<vmem>>, vector<8x32xf32>
    %1 = arith.truncf %0 : vector<8x32xf32> to vector<8x32xbf16>
    %c0_1 = arith.constant 0 : index
    %c0_2 = arith.constant 0 : index
    %2 = vector.load %arg4[%c0_1, %c0_2] : memref<32x32xbf16, #tpu.memory_space<vmem>>, vector<32x32xbf16>
    %cst = arith.constant dense<0.000000e+00> : vector<8x32xf32>
    %3 = tpu.matmul %1, %2, %cst {dimension_numbers = #tpu.dot_dimension_numbers<[1], [0], [0], [1], [0, 0, 1, 1], [], []>} : vector<8x32xbf16>, vector<32x32xbf16>, vector<8x32xf32> -> vector<8x32xf32>
    %c0_3 = arith.constant 0 : index
    %c0_4 = arith.constant 0 : index
    %4 = vector.load %arg2[%c0_3, %c0_4] : memref<8x32xf32, #tpu.memory_space<vmem>>, vector<8x32xf32>
    %5 = arith.truncf %4 : vector<8x32xf32> to vector<8x32xbf16>
    %c0_5 = arith.constant 0 : index
    %c0_6 = arith.constant 0 : index
    %6 = vector.load %arg5[%c0_5, %c0_6] : memref<32x32xbf16, #tpu.memory_space<vmem>>, vector<32x32xbf16>
    %cst_7 = arith.constant dense<0.000000e+00> : vector<8x32xf32>
    %7 = tpu.matmul %5, %6, %cst_7 {dimension_numbers = #tpu.dot_dimension_numbers<[1], [0], [0], [1], [0, 0, 1, 1], [], []>} : vector<8x32xbf16>, vector<32x32xbf16>, vector<8x32xf32> -> vector<8x32xf32>
    %8 = arith.addf %3, %7 : vector<8x32xf32>
    %c0_8 = arith.constant 0 : index
    %c0_9 = arith.constant 0 : index
    %9 = vector.load %arg3[%c0_8, %c0_9] : memref<8x32xf32, #tpu.memory_space<vmem>>, vector<8x32xf32>
    %10 = arith.truncf %9 : vector<8x32xf32> to vector<8x32xbf16>
    %c0_10 = arith.constant 0 : index
    %c0_11 = arith.constant 0 : index
    %11 = vector.load %arg6[%c0_10, %c0_11] : memref<32x32xbf16, #tpu.memory_space<vmem>>, vector<32x32xbf16>
    %cst_12 = arith.constant dense<0.000000e+00> : vector<8x32xf32>
    %12 = tpu.matmul %10, %11, %cst_12 {dimension_numbers = #tpu.dot_dimension_numbers<[1], [0], [0], [1], [0, 0, 1, 1], [], []>} : vector<8x32xbf16>, vector<32x32xbf16>, vector<8x32xf32> -> vector<8x32xf32>
    %13 = arith.addf %8, %12 : vector<8x32xf32>
    %c0_13 = arith.constant 0 : index
    %c0_14 = arith.constant 0 : index
    %14 = vector.load %arg7[%c0_13, %c0_14] : memref<1x32xf32, #tpu.memory_space<vmem>>, vector<1x32xf32>
    %15 = vector.broadcast %14 : vector<1x32xf32> to vector<8x32xf32>
    %16 = arith.addf %13, %15 : vector<8x32xf32>
    %cst_15 = arith.constant 0.000000e+00 : f32
    %17 = vector.broadcast %cst_15 : f32 to vector<8x32xf32>
    %18 = arith.maximumf %16, %17 : vector<8x32xf32>
    %19 = arith.truncf %18 : vector<8x32xf32> to vector<8x32xbf16>
    %c0_16 = arith.constant 0 : index
    %c0_17 = arith.constant 0 : index
    %20 = vector.load %arg8[%c0_16, %c0_17] : memref<32x32xbf16, #tpu.memory_space<vmem>>, vector<32x32xbf16>
    %cst_18 = arith.constant dense<0.000000e+00> : vector<8x32xf32>
    %21 = tpu.matmul %19, %20, %cst_18 {dimension_numbers = #tpu.dot_dimension_numbers<[1], [0], [0], [1], [0, 0, 1, 1], [], []>} : vector<8x32xbf16>, vector<32x32xbf16>, vector<8x32xf32> -> vector<8x32xf32>
    %c0_19 = arith.constant 0 : index
    %c0_20 = arith.constant 0 : index
    %22 = vector.load %arg9[%c0_19, %c0_20] : memref<1x32xf32, #tpu.memory_space<vmem>>, vector<1x32xf32>
    %23 = vector.broadcast %22 : vector<1x32xf32> to vector<8x32xf32>
    %24 = arith.addf %21, %23 : vector<8x32xf32>
    %cst_21 = arith.constant 0.000000e+00 : f32
    %25 = vector.broadcast %cst_21 : f32 to vector<8x32xf32>
    %26 = arith.maximumf %24, %25 : vector<8x32xf32>
    %27 = arith.truncf %26 : vector<8x32xf32> to vector<8x32xbf16>
    %c0_22 = arith.constant 0 : index
    %c0_23 = arith.constant 0 : index
    %28 = vector.load %arg10[%c0_22, %c0_23] : memref<32x32xbf16, #tpu.memory_space<vmem>>, vector<32x32xbf16>
    %cst_24 = arith.constant dense<0.000000e+00> : vector<8x32xf32>
    %29 = tpu.matmul %27, %28, %cst_24 {dimension_numbers = #tpu.dot_dimension_numbers<[1], [0], [0], [1], [0, 0, 1, 1], [], []>} : vector<8x32xbf16>, vector<32x32xbf16>, vector<8x32xf32> -> vector<8x32xf32>
    %c0_25 = arith.constant 0 : index
    %c0_26 = arith.constant 0 : index
    %30 = vector.load %arg11[%c0_25, %c0_26] : memref<1x32xf32, #tpu.memory_space<vmem>>, vector<1x32xf32>
    %31 = vector.broadcast %30 : vector<1x32xf32> to vector<8x32xf32>
    %32 = arith.addf %29, %31 : vector<8x32xf32>
    %cst_27 = arith.constant 0.000000e+00 : f32
    %33 = vector.broadcast %cst_27 : f32 to vector<8x32xf32>
    %34 = arith.maximumf %32, %33 : vector<8x32xf32>
    %35 = arith.truncf %34 : vector<8x32xf32> to vector<8x32xbf16>
    %c0_28 = arith.constant 0 : index
    %c0_29 = arith.constant 0 : index
    %36 = vector.load %arg12[%c0_28, %c0_29] : memref<32x32xbf16, #tpu.memory_space<vmem>>, vector<32x32xbf16>
    %cst_30 = arith.constant dense<0.000000e+00> : vector<8x32xf32>
    %37 = tpu.matmul %35, %36, %cst_30 {dimension_numbers = #tpu.dot_dimension_numbers<[1], [0], [0], [1], [0, 0, 1, 1], [], []>} : vector<8x32xbf16>, vector<32x32xbf16>, vector<8x32xf32> -> vector<8x32xf32>
    %c0_31 = arith.constant 0 : index
    %c0_32 = arith.constant 0 : index
    %38 = vector.load %arg13[%c0_31, %c0_32] : memref<1x32xf32, #tpu.memory_space<vmem>>, vector<1x32xf32>
    %39 = vector.broadcast %38 : vector<1x32xf32> to vector<8x32xf32>
    %40 = arith.addf %37, %39 : vector<8x32xf32>
    %cst_33 = arith.constant 0.000000e+00 : f32
    %41 = vector.broadcast %cst_33 : f32 to vector<8x32xf32>
    %42 = arith.maximumf %40, %41 : vector<8x32xf32>
    %43 = arith.truncf %42 : vector<8x32xf32> to vector<8x32xbf16>
    %c0_34 = arith.constant 0 : index
    %c0_35 = arith.constant 0 : index
    %44 = vector.load %arg14[%c0_34, %c0_35] : memref<32x1xbf16, #tpu.memory_space<vmem>>, vector<32x1xbf16>
    %cst_36 = arith.constant dense<0.000000e+00> : vector<8x1xf32>
    %45 = tpu.matmul %43, %44, %cst_36 {dimension_numbers = #tpu.dot_dimension_numbers<[1], [0], [0], [1], [0, 0, 1, 1], [], []>} : vector<8x32xbf16>, vector<32x1xbf16>, vector<8x1xf32> -> vector<8x1xf32>
    %c0_37 = arith.constant 0 : index
    %c0_38 = arith.constant 0 : index
    %46 = vector.load %arg15[%c0_37, %c0_38] : memref<1x1xf32, #tpu.memory_space<vmem>>, vector<1x1xf32>
    %47 = vector.broadcast %46 : vector<1x1xf32> to vector<8x1xf32>
    %48 = arith.addf %45, %47 : vector<8x1xf32>
    %c0_39 = arith.constant 0 : index
    %c0_40 = arith.constant 0 : index
    %49 = vector.load %arg16[%c0_39, %c0_40] : memref<8x1xf32, #tpu.memory_space<vmem>>, vector<8x1xf32>
    tpu.vector_store %arg16[%c0_39, %c0_40], %48 {strides = array<i32>} : memref<8x1xf32, #tpu.memory_space<vmem>>, vector<8x1xf32>,
    return
  }
  func.func @transform_0(%arg0: i32) -> (i32, i32) {
    %c0_i32 = arith.constant 0 : i32
    %c0_i32_0 = arith.constant 0 : i32
    return %arg0, %c0_i32 : i32, i32
  }
  func.func @transform_1(%arg0: i32) -> (i32, i32) {
    %c0_i32 = arith.constant 0 : i32
    %c0_i32_0 = arith.constant 0 : i32
    return %arg0, %c0_i32 : i32, i32
  }
  func.func @transform_2(%arg0: i32) -> (i32, i32) {
    %c0_i32 = arith.constant 0 : i32
    %c0_i32_0 = arith.constant 0 : i32
    return %arg0, %c0_i32 : i32, i32
  }
  func.func @transform_3(%arg0: i32) -> (i32, i32) {
    %c0_i32 = arith.constant 0 : i32
    %c0_i32_0 = arith.constant 0 : i32
    %c0_i32_1 = arith.constant 0 : i32
    return %c0_i32, %c0_i32_0 : i32, i32
  }
  func.func @transform_4(%arg0: i32) -> (i32, i32) {
    %c0_i32 = arith.constant 0 : i32
    %c0_i32_0 = arith.constant 0 : i32
    %c0_i32_1 = arith.constant 0 : i32
    return %c0_i32, %c0_i32_0 : i32, i32
  }
  func.func @transform_5(%arg0: i32) -> (i32, i32) {
    %c0_i32 = arith.constant 0 : i32
    %c0_i32_0 = arith.constant 0 : i32
    %c0_i32_1 = arith.constant 0 : i32
    return %c0_i32, %c0_i32_0 : i32, i32
  }
  func.func @transform_6(%arg0: i32) -> (i32, i32) {
    %c0_i32 = arith.constant 0 : i32
    %c0_i32_0 = arith.constant 0 : i32
    %c0_i32_1 = arith.constant 0 : i32
    return %c0_i32, %c0_i32_0 : i32, i32
  }
  func.func @transform_7(%arg0: i32) -> (i32, i32) {
    %c0_i32 = arith.constant 0 : i32
    %c0_i32_0 = arith.constant 0 : i32
    %c0_i32_1 = arith.constant 0 : i32
    return %c0_i32, %c0_i32_0 : i32, i32
  }
  func.func @transform_8(%arg0: i32) -> (i32, i32) {
    %c0_i32 = arith.constant 0 : i32
    %c0_i32_0 = arith.constant 0 : i32
    %c0_i32_1 = arith.constant 0 : i32
    return %c0_i32, %c0_i32_0 : i32, i32
  }
  func.func @transform_9(%arg0: i32) -> (i32, i32) {
    %c0_i32 = arith.constant 0 : i32
    %c0_i32_0 = arith.constant 0 : i32
    %c0_i32_1 = arith.constant 0 : i32
    return %c0_i32, %c0_i32_0 : i32, i32
  }
  func.func @transform_10(%arg0: i32) -> (i32, i32) {
    %c0_i32 = arith.constant 0 : i32
    %c0_i32_0 = arith.constant 0 : i32
    %c0_i32_1 = arith.constant 0 : i32
    return %c0_i32, %c0_i32_0 : i32, i32
  }
  func.func @transform_11(%arg0: i32) -> (i32, i32) {
    %c0_i32 = arith.constant 0 : i32
    %c0_i32_0 = arith.constant 0 : i32
    %c0_i32_1 = arith.constant 0 : i32
    return %c0_i32, %c0_i32_0 : i32, i32
  }
  func.func @transform_12(%arg0: i32) -> (i32, i32) {
    %c0_i32 = arith.constant 0 : i32
    %c0_i32_0 = arith.constant 0 : i32
    %c0_i32_1 = arith.constant 0 : i32
    return %c0_i32, %c0_i32_0 : i32, i32
  }
  func.func @transform_13(%arg0: i32) -> (i32, i32) {
    %c0_i32 = arith.constant 0 : i32
    %c0_i32_0 = arith.constant 0 : i32
    %c0_i32_1 = arith.constant 0 : i32
    return %c0_i32, %c0_i32_0 : i32, i32
  }
  func.func @transform_14(%arg0: i32) -> (i32, i32) {
    %c0_i32 = arith.constant 0 : i32
    %c0_i32_0 = arith.constant 0 : i32
    %c0_i32_1 = arith.constant 0 : i32
    return %c0_i32, %c0_i32_0 : i32, i32
  }
  func.func @transform_15(%arg0: i32) -> (i32, i32) {
    %c0_i32 = arith.constant 0 : i32
    %c0_i32_0 = arith.constant 0 : i32
    return %arg0, %c0_i32 : i32, i32
  }
}

</mosaic_0001>

<bundles_post_ra>
// kernel: tpu_custom_call.1
= control target key start
LH: loop header
LB: loop body
LE: loop exit
PB: predicated region body
PF: predicated region fallthrough
CT: control target
= control target key end

     0   :  { %s1133_s0 = inlined_call_operand.hbm [shape: f32[8,32], index: 0, kind: input, shape index: {}]   ;;  %s1134_s1 = inlined_call_operand.hbm [shape: f32[8,32], index: 1, kind: input, shape index: {}]   ;;  %s1135_s2 = inlined_call_operand.hbm [shape: f32[8,32], index: 2, kind: input, shape index: {}]   ;;  %s1136_s3 = inlined_call_operand.vmem [shape: bf16[32,32], index: 3, kind: input, shape index: {}]   ;;  %s1137_s4 = inlined_call_operand.vmem [shape: bf16[32,32], index: 4, kind: input, shape index: {}]   ;;  %s1138_s5 = inlined_call_operand.hbm [shape: bf16[32,32], index: 5, kind: input, shape index: {}]   ;;  %s1139_s6 = inlined_call_operand.vmem [shape: f32[1,32], index: 6, kind: input, shape index: {}]   ;;  %s1140_s7 = inlined_call_operand.hbm [shape: bf16[32,32], index: 7, kind: input, shape index: {}]   ;;  %s1141_s8 = inlined_call_operand.vmem [shape: f32[1,32], index: 8, kind: input, shape index: {}]   ;;  %s1142_s9 = inlined_call_operand.vmem [shape: bf16[32,32], index: 9, kind: input, shape index: {}]   ;;  %s1143_s10 = inlined_call_operand.vmem [shape: f32[1,32], index: 10, kind: input, shape index: {}]   ;;  %s1144_s11 = inlined_call_operand.hbm [shape: bf16[32,32], index: 11, kind: input, shape index: {}]   ;;  %s1145_s12 = inlined_call_operand.vmem [shape: f32[1,32], index: 12, kind: input, shape index: {}]   ;;  %s1146_s13 = inlined_call_operand.vmem [shape: bf16[32,1], index: 13, kind: input, shape index: {}]   ;;  %s1147_s14 = inlined_call_operand.<no memory space> [shape: f32[1,1], index: 14, kind: input, shape index: {}]   ;;  %s1148_s15 = inlined_call_operand.vmem [shape: f32[8,1], index: 15, kind: output, shape index: {}]  }
   0x1   :  { %v20_v0 = vstv %s1147_s14 }
   0x2   :  { %21 = vst [vmem:[#allocation2] sm:$0x1] %v20_v0 }
   0x3   :  { %22 = vsyncpa [#allocation4], 0 }
   0x4   :  { %23 = vsyncpa [#allocation6], 0 }
   0x5   :  { %24 = vsyncpa [#allocation9], 0 }
   0x6   :  { %25 = vsyncpa [#allocation12], 0  ;;  %s871_s20 = smov [#allocation5]   ;;  %s872_s22 = smov [#allocation8]  }
   0x7   :  { %s42_s21 = sshll.u32 %s871_s20, 4  ;;  %s65_s23 = sshll.u32 %s872_s22, 4  ;;  %s43_s21 = int_to_ptr.vmem [resolvable:$true] %s42_s21  ;;  %s964_s23 = int_to_ptr.vmem [resolvable:$true] %s65_s23 }
   0x8   :  { %s731_s26 = scalar_lea.hbm %s1134_s1, 128 }
   0x9   :  { %p732_p0 = scmp.ne.s32.totalorder %s1134_s1, %s731_s26  ;;  %p735_p1 = scmp.lt.u32.totalorder %s731_s26, %s1134_s1 }
   0xb   :  { %p737_p2 = pnand %p735_p1, %p732_p0 }
   0xd   :  { %740 = shalt.err (!%p737_p2)
}
   0xe   :  { %s741_s30 = scalar_lea.vmem %s43_s21, 128  ;;  %p746_p4 = scmp.lt.s32.totalorder %s43_s21, %s43_s21 }
   0xf   :  { %p742_p3 = scmp.ne.s32.totalorder %s43_s21, %s741_s30  ;;  %p747_p5 = scmp.lt.s32.totalorder %s741_s30, %s741_s30 }
  0x11   :  { %p748_p6 = por %p747_p5, %p746_p4 }
  0x13   :  { %p749_p7 = pnand %p748_p6, %p742_p3 }
  0x15   :  { %752 = shalt.err (!%p749_p7)
}
  0x16   :  { %45 = dma.hbm_to_vmem [thread:$0]  %s1134_s1, 128, %s43_s21, [#allocation6]  }
  0x17   :  { %s753_s20 = scalar_lea.hbm %s1138_s5, 256 }
  0x18   :  { %p754_p8 = scmp.ne.s32.totalorder %s1138_s5, %s753_s20  ;;  %p757_p9 = scmp.lt.u32.totalorder %s753_s20, %s1138_s5 }
  0x1a   :  { %p759_p10 = pnand %p757_p9, %p754_p8 }
  0x1c   :  { %762 = shalt.err (!%p759_p10)
}
  0x1d   :  { %s763_s27 = scalar_lea.vmem %s964_s23, 256  ;;  %p768_p12 = scmp.lt.s32.totalorder %s964_s23, %s964_s23 }
  0x1e   :  { %p764_p11 = scmp.ne.s32.totalorder %s964_s23, %s763_s27  ;;  %p769_p13 = scmp.lt.s32.totalorder %s763_s27, %s763_s27 }
  0x20   :  { %p770_p0 = por %p769_p13, %p768_p12 }
  0x22   :  { %p771_p1 = pnand %p770_p0, %p764_p11 }
  0x24   :  { %774 = shalt.err (!%p771_p1)
}
  0x25   :  { %s873_s1 = smov 64   ;;  %s874_s21 = smov 4  }
  0x26   :  { %71 = dma.hbm_to_vmem [thread:$0]  %s1138_s5, 256, %s964_s23, [#allocation9], %s873_s1, %s873_s1, %s874_s21  }
  0x27   :  { %s875_s29 = smov [#allocation3]   ;;  %s876_s16 = smov [#allocation7]  }
  0x28   :  { %s32_s30 = sshll.u32 %s875_s29, 4  ;;  %s52_s17 = sshll.u32 %s876_s16, 4  ;;  %s33_s30 = int_to_ptr.vmem [resolvable:$true] %s32_s30  ;;  %s53_s17 = int_to_ptr.vmem [resolvable:$true] %s52_s17 }
  0x29   :  { %s775_s20 = scalar_lea.hbm %s1133_s0, 128 }
  0x2a   :  { %p776_p2 = scmp.ne.s32.totalorder %s1133_s0, %s775_s20  ;;  %p779_p3 = scmp.lt.u32.totalorder %s775_s20, %s1133_s0 }
  0x2c   :  { %p781_p4 = pnand %p779_p3, %p776_p2 }
  0x2e   :  { %784 = shalt.err (!%p781_p4)
}
  0x2f   :  { %s785_s5 = scalar_lea.vmem %s33_s30, 128  ;;  %p790_p6 = scmp.lt.s32.totalorder %s33_s30, %s33_s30 }
  0x30   :  { %p786_p5 = scmp.ne.s32.totalorder %s33_s30, %s785_s5  ;;  %p791_p7 = scmp.lt.s32.totalorder %s785_s5, %s785_s5 }
  0x32   :  { %p792_p8 = por %p791_p7, %p790_p6 }
  0x34   :  { %p793_p9 = pnand %p792_p8, %p786_p5 }
  0x36   :  { %796 = shalt.err (!%p793_p9)
}
  0x37   :  { %35 = dma.hbm_to_vmem [thread:$0]  %s1133_s0, 128, %s33_s30, [#allocation4]  }
  0x38   :  { %s797_s29 = scalar_lea.hbm %s1135_s2, 128 }
  0x39   :  { %p798_p10 = scmp.ne.s32.totalorder %s1135_s2, %s797_s29  ;;  %p801_p11 = scmp.lt.u32.totalorder %s797_s29, %s1135_s2 }
  0x3b   :  { %p803_p12 = pnand %p801_p11, %p798_p10 }
  0x3d   :  { %806 = shalt.err (!%p803_p12)
}
  0x3e   :  { %s807_s22 = scalar_lea.vmem %s53_s17, 128  ;;  %p812_p0 = scmp.lt.s32.totalorder %s53_s17, %s53_s17 }
  0x3f   :  { %p808_p13 = scmp.ne.s32.totalorder %s53_s17, %s807_s22  ;;  %p813_p1 = scmp.lt.s32.totalorder %s807_s22, %s807_s22 }
  0x41   :  { %p814_p2 = por %p813_p1, %p812_p0 }
  0x43   :  { %p815_p3 = pnand %p814_p2, %p808_p13 }
  0x45   :  { %818 = shalt.err (!%p815_p3)
}
  0x46   :  { %55 = dma.hbm_to_vmem [thread:$0]  %s1135_s2, 128, %s53_s17, [#allocation6]  }
  0x47   :  { %s877_s24 = smov [#allocation10]   ;;  %s878_s26 = smov [#allocation11]  }
  0x48   :  { %s79_s25 = sshll.u32 %s877_s24, 4  ;;  %s97_s5 = sshll.u32 %s878_s26, 4  ;;  %s80_s25 = int_to_ptr.vmem [resolvable:$true] %s79_s25  ;;  %s1022_s5 = int_to_ptr.vmem [resolvable:$true] %s97_s5 }
  0x49   :  { %s819_s28 = scalar_lea.hbm %s1140_s7, 256 }
  0x4a   :  { %p820_p4 = scmp.ne.s32.totalorder %s1140_s7, %s819_s28  ;;  %p823_p5 = scmp.lt.u32.totalorder %s819_s28, %s1140_s7 }
  0x4c   :  { %p825_p6 = pnand %p823_p5, %p820_p4 }
  0x4e   :  { %828 = shalt.err (!%p825_p6)
}
  0x4f   :  { %s829_s2 = scalar_lea.vmem %s80_s25, 256  ;;  %p834_p8 = scmp.lt.s32.totalorder %s80_s25, %s80_s25 }
  0x50   :  { %p830_p7 = scmp.ne.s32.totalorder %s80_s25, %s829_s2  ;;  %p835_p9 = scmp.lt.s32.totalorder %s829_s2, %s829_s2 }
  0x52   :  { %p836_p10 = por %p835_p9, %p834_p8 }
  0x54   :  { %p837_p11 = pnand %p836_p10, %p830_p7 }
  0x56   :  { %840 = shalt.err (!%p837_p11)
}
  0x57   :  { %85 = dma.hbm_to_vmem [thread:$0]  %s1140_s7, 256, %s80_s25, [#allocation9], %s873_s1, %s873_s1, %s874_s21  }
  0x58   :  { %s841_s0 = scalar_lea.hbm %s1144_s11, 256 }
  0x59   :  { %p842_p12 = scmp.ne.s32.totalorder %s1144_s11, %s841_s0  ;;  %p845_p13 = scmp.lt.u32.totalorder %s841_s0, %s1144_s11 }
  0x5b   :  { %p847_p0 = pnand %p845_p13, %p842_p12 }
  0x5d   :  { %850 = shalt.err (!%p847_p0)
}
  0x5e   :  { %s851_s27 = scalar_lea.vmem %s1022_s5, 256  ;;  %p856_p2 = scmp.lt.s32.totalorder %s1022_s5, %s1022_s5 }
  0x5f   :  { %p852_p1 = scmp.ne.s32.totalorder %s1022_s5, %s851_s27  ;;  %p857_p3 = scmp.lt.s32.totalorder %s851_s27, %s851_s27 }
  0x61   :  { %p858_p4 = por %p857_p3, %p856_p2 }
  0x63   :  { %p859_p5 = pnand %p858_p4, %p852_p1 }
  0x65   :  { %862 = shalt.err (!%p859_p5)
}
  0x66   :  { %103 = dma.hbm_to_vmem [thread:$0]  %s1144_s11, 256, %s1022_s5, [#allocation12], %s873_s1, %s873_s1, %s874_s21  }
  0x67   :  { %863 = dma.done.wait [#allocation4], 128  }
  0x68   :  { %864 = vsyncadd [#allocation4], 4294967168 }
  0x69   :  { %865 = dma.done.wait [#allocation6], 256  }
  0x6a   :  { %866 = vsyncadd [#allocation6], 4294967040 }
  0x6b   :  { %867 = dma.done.wait [#allocation9], 512  }
  0x6c   :  { %868 = vsyncadd [#allocation9], 4294966784 }
  0x6d   :  { %869 = dma.done.wait [#allocation12], 256  }
  0x6e   :  { %870 = vsyncadd [#allocation12], 4294967040  ;;  %v879_v1 = vmov 0.0   ;;  %vm880_vm0 = vmmov 0   ;;  %v717_v2 = vld [vmem:[%s1137_s4] sm:$0xff]   ;;  %v719_v4 = vld [vmem:[%s1137_s4 + $0x8] sm:$0xff]  }
  0x6f   :  { %651 = vmatprep.subr.bf16.mxu0 %v879_v1  ;;  %659 = vmatprep.subr.bf16.mxu1 %v879_v1  ;;  %v718_v3 = vld [vmem:[%s1136_s3] sm:$0xff]   ;;  %v720_v5 = vld [vmem:[%s1136_s3 + $0x8] sm:$0xff]   ;;  %vm153_vm1 = vcmask 261120   ;;  %v252_v12 = vld [vmem:[#allocation7] sm:$0xff]  ;;  %vm594_vm2 = vcmask 7168  }
  0x70   :  { %655 = vmatprep.mubr.msk.bf16.mxu0 %vm880_vm0, %v879_v1  ;;  %663 = vmatprep.mubr.msk.bf16.mxu1 %vm880_vm0, %v879_v1  ;;  %v135_v6 = vld [vmem:[#allocation5] sm:$0xff]  ;;  %v129_v7 = vld [vmem:[#allocation3] sm:$0xff]  ;;  %v721_v10 = vld [vmem:[#allocation8] sm:$0xff]   ;;  %v253_v13 = vpack.c.bf16 %v252_v12, %v252_v12 }
  0x71   :  { %652 = vmatpush3.bf16.msra.mxu0 %v717_v2  ;;  %660 = vmatpush3.bf16.msra.mxu1 %v718_v3  ;;  %v136_v8 = vpack.c.bf16 %v135_v6, %v135_v6  ;;  %v130_v9 = vpack.c.bf16 %v129_v7, %v129_v7  ;;  %v722_v11 = vld [vmem:[#allocation8 + $0x8] sm:$0xff]   ;;  %v723_v14 = vld [vmem:[#allocation10] sm:$0xff]   ;;  %v724_v15 = vld [vmem:[#allocation10 + $0x8] sm:$0xff]  }
  0x72   :  { %653 = vmatprep.subr.bf16.mxu0 %v879_v1  ;;  %661 = vmatprep.subr.bf16.mxu1 %v879_v1  ;;  %v613_v26 = vld [vmem:[%s1139_s6] ss:$0 sm:$0xff]  ;;  %v726_v35 = vld [vmem:[%s1142_s9 + $0x8] sm:$0xff]  }
  0x73   :  { %v725_v34 = vld [vmem:[%s1142_s9] sm:$0xff]   ;;  %v730_v55 = vld [vmem:[%s1146_s13 + $0x8] sm:$0xff]  }
  0x74   :  { %v614_v36 = vld [vmem:[%s1141_s8] ss:$0 sm:$0xff]  ;;  %v728_v45 = vld [vmem:[#allocation11 + $0x8] sm:$0xff]  }
  0x75   :  { %654 = vmatpush3.bf16.msra.mxu0 %v719_v4  ;;  %662 = vmatpush3.bf16.msra.mxu1 %v720_v5  ;;  %v727_v44 = vld [vmem:[#allocation11] sm:$0xff]  }
  0x76   :  { %667 = vmatprep.subr.bf16.mxu0 %v879_v1  ;;  %675 = vmatprep.subr.bf16.mxu1 %v879_v1  ;;  %v618_v46 = vld [vmem:[%s1143_s10] ss:$0 sm:$0xff] }
  0x77   :  { %v729_v54 = vld [vmem:[%s1146_s13] sm:$0xff]  }
  0x78   :  { %656 = vmatmul.mubr.msk.bf16.vlgmr.msra.gmra.mrb[0].mxu0 %vm153_vm1, %v136_v8  ;;  %664 = vmatmul.mubr.msk.bf16.vlgmr.msra.gmra.mrb[0].mxu1 %vm153_vm1, %v130_v9  ;;  %v622_v56 = vld [vmem:[%s1145_s12] ss:$0 sm:$0xff] }
  0x79   :  { %668 = vmatpush3.bf16.msra.mxu0 %v721_v10  ;;  %671 = vmatprep.mubr.msk.bf16.mxu0 %vm880_vm0, %v879_v1  ;;  %v626_v0 = vld [vmem:[#allocation2] ss:$0 sm:$0xff] }
  0x7a   :  { %669 = vmatprep.subr.bf16.mxu0 %v879_v1  ;;  %679 = vmatprep.mubr.msk.bf16.mxu1 %vm880_vm0, %v879_v1 }
  0x7b   :  { %676 = vmatpush3.bf16.msra.mxu1 %v723_v14 }
  0x7c   :  { %677 = vmatprep.subr.bf16.mxu1 %v879_v1 }
  0x7d   :  { %670 = vmatpush3.bf16.msra.mxu0 %v722_v11 }
  0x7e   :  { %683 = vmatprep.subr.bf16.mxu0 %v879_v1 }
  0x7f   :  { %678 = vmatpush3.bf16.msra.mxu1 %v724_v15 }
  0x80   :  { %672 = vmatmul.mubr.msk.bf16.vlgmr.msra.gmra.mrb[4].mxu0 %vm153_vm1, %v253_v13  ;;  %691 = vmatprep.subr.bf16.mxu1 %v879_v1 }
  0x81   :  { %687 = vmatprep.mubr.msk.bf16.mxu0 %vm880_vm0, %v879_v1  ;;  %684 = vmatpush3.bf16.msra.mxu0 %v725_v34 }
  0x82   :  { %685 = vmatprep.subr.bf16.mxu0 %v879_v1 }
  0x85   :  { %686 = vmatpush3.bf16.msra.mxu0 %v726_v35 }
  0x86   :  { %699 = vmatprep.subr.bf16.mxu0 %v879_v1 }
 0x14b   :  { %v191_v16 = vpop.f32.mrb[0].mxu0  ;;  %v246_v18 = vpop.f32.mrb[0].mxu1 }
 0x14c   :  { %v657_v17 = vpop.f32.mrb[1].mxu0  ;;  %v247_v19 = vadd.f32 %v246_v18, %v191_v16  ;;  %v665_v21 = vpop.f32.mrb[1].mxu1 }
 0x14d   :  { %v194_v20 = vpop.f32.mrb[2].mxu0  ;;  %v249_v23 = vpop.f32.mrb[2].mxu1 }
 0x14e   :  { %v658_v22 = vpop.f32.mrb[3].mxu0  ;;  %v666_v24 = vpop.f32.mrb[3].mxu1 }
 0x153   :  { %v307_v25 = vpop.f32.mrb[4].mxu0 }
 0x154   :  { %v313_v27 = vadd.f32 %v307_v25, %v247_v19  ;;  %v673_v28 = vpop.f32.mrb[5].mxu0 }
 0x155   :  { %v310_v29 = vpop.f32.mrb[6].mxu0 }
 0x156   :  { %v321_v30 = vadd.f32 %v613_v26, %v313_v27  ;;  %v674_v31 = vpop.f32.mrb[7].mxu0 }
 0x158   :  { %v322_v32 = vmax.f32 %v321_v30, 0.0 }
 0x15a   :  { %v323_v33 = vpack.c.bf16 %v322_v32, %v322_v32 }
 0x15c   :  { %680 = vmatmul.mubr.msk.bf16.vlgmr.msra.gmra.mrb[4].mxu1 %vm153_vm1, %v323_v33 }
 0x15d   :  { %695 = vmatprep.mubr.msk.bf16.mxu1 %vm880_vm0, %v879_v1  ;;  %692 = vmatpush3.bf16.msra.mxu1 %v727_v44 }
 0x15e   :  { %693 = vmatprep.subr.bf16.mxu1 %v879_v1 }
 0x161   :  { %694 = vmatpush3.bf16.msra.mxu1 %v728_v45 }
 0x22f   :  { %v384_v37 = vpop.f32.mrb[4].mxu1 }
 0x230   :  { %v385_v38 = vadd.f32 %v614_v36, %v384_v37  ;;  %v681_v39 = vpop.f32.mrb[5].mxu1 }
 0x231   :  { %v387_v40 = vpop.f32.mrb[6].mxu1 }
 0x232   :  { %v390_v41 = vmax.f32 %v385_v38, 0.0  ;;  %v682_v42 = vpop.f32.mrb[7].mxu1 }
 0x234   :  { %v391_v43 = vpack.c.bf16 %v390_v41, %v390_v41 }
 0x236   :  { %688 = vmatmul.mubr.msk.bf16.vlgmr.msra.gmra.mrb[8].mxu0 %vm153_vm1, %v391_v43 }
 0x237   :  { %703 = vmatprep.mubr.msk.bf16.mxu0 %vm880_vm0, %v879_v1  ;;  %700 = vmatpush3.bf16.msra.mxu0 %v729_v54 }
 0x238   :  { %701 = vmatprep.subr.bf16.mxu0 %v879_v1 }
 0x23b   :  { %702 = vmatpush3.bf16.msra.mxu0 %v730_v55 }
 0x309   :  { %v452_v47 = vpop.f32.mrb[8].mxu0 }
 0x30a   :  { %v453_v48 = vadd.f32 %v618_v46, %v452_v47  ;;  %v689_v49 = vpop.f32.mrb[9].mxu0 }
 0x30b   :  { %v455_v50 = vpop.f32.mrb[10].mxu0 }
 0x30c   :  { %v458_v51 = vmax.f32 %v453_v48, 0.0  ;;  %v690_v52 = vpop.f32.mrb[11].mxu0 }
 0x30e   :  { %v459_v53 = vpack.c.bf16 %v458_v51, %v458_v51 }
 0x310   :  { %696 = vmatmul.mubr.msk.bf16.vlgmr.msra.gmra.mrb[8].mxu1 %vm153_vm1, %v459_v53 }
 0x3e3   :  { %v520_v57 = vpop.f32.mrb[8].mxu1 }
 0x3e4   :  { %v521_v58 = vadd.f32 %v622_v56, %v520_v57  ;;  %v697_v59 = vpop.f32.mrb[9].mxu1 }
 0x3e5   :  { %v523_v60 = vpop.f32.mrb[10].mxu1 }
 0x3e6   :  { %v526_v61 = vmax.f32 %v521_v58, 0.0  ;;  %v698_v62 = vpop.f32.mrb[11].mxu1 }
 0x3e8   :  { %v527_v63 = vpack.c.bf16 %v526_v61, %v526_v61 }
 0x3ea   :  { %704 = vmatmul.mubr.msk.bf16.vlgmr.msra.gmra.mrb[12].mxu0 %vm153_vm1, %v527_v63 }
 0x4bd   :  { %v588_v1 = vpop.f32.mrb[12].mxu0 }
 0x4be   :  { %v589_v2 = vadd.f32 %v626_v0, %v588_v1  ;;  %v705_v3 = vpop.f32.mrb[13].mxu0 }
 0x4bf   :  { %v591_v4 = vpop.f32.mrb[14].mxu0 }
 0x4c0   :  { %595 = vst.msk [vmem:[%s1148_s15] sm:$0xff] %vm594_vm2, %v589_v2  ;;  %v706_v5 = vpop.f32.mrb[15].mxu0 }
 0x4c1   :  { %600 = vsyncpa [#allocation4], 1 }
 0x4c2   :  { %601 = vsyncpa [#allocation6], 1 }
 0x4c3   :  { %602 = vsyncpa [#allocation9], 1 }
 0x4c4   :  { %603 = vsyncpa [#allocation12], 1 }

</bundles_post_ra>
